<compile_context>
chip_gen: v7x
topology: tpu7x:2x2x1
jax: 0.10.0
libtpu: 0.0.40
codegen_flags: <defaults>
</compile_context>

<pallas_src>
import jax
import jax.numpy as jnp
from jax.experimental import pallas as pl
from jax.experimental.pallas import tpu as pltpu


def dyt_kernel(alpha_ref, x_ref, gamma_ref, beta_ref, o_ref):
    """One grid step handles one (TR, D) row tile.

    alpha_ref: (1,)     SMEM scalar
    x_ref:     (TR, D)  VMEM
    gamma_ref: (1, D)   VMEM (resident across grid)
    beta_ref:  (1, D)   VMEM (resident across grid)
    o_ref:     (TR, D)  VMEM
    """
    alpha = alpha_ref[0]                               # f32 scalar from SMEM
    x = x_ref[...].astype(jnp.float32)                 # no-op cast if already f32
    y = jnp.tanh(x * alpha)                            # EUP transcendental
    g = gamma_ref[...].astype(jnp.float32)             # (1, D) broadcasts over rows
    b = beta_ref[...].astype(jnp.float32)
    o_ref[...] = (y * g + b).astype(o_ref.dtype)


def dynamic_tanh_norm(x, alpha, gamma, beta, *, row_tile=256):
    """Pallas DynamicTanhNorm forward.

    x:     (..., D)
    alpha: (1,)   scalar parameter
    gamma: (D,)   per-channel scale
    beta:  (D,)   per-channel shift
    returns: same shape/dtype as x.
    """
    orig_shape = x.shape
    D = orig_shape[-1]
    x2 = x.reshape(-1, D)
    N = x2.shape[0]

    # Row tile: multiple of 8 sublanes; shrink for tiny inputs, pad otherwise.
    TR = row_tile
    if N < TR:
        TR = max(8, ((N + 7) // 8) * 8)
    n_pad = pl.cdiv(N, TR) * TR
    if n_pad != N:
        x2 = jnp.pad(x2, ((0, n_pad - N), (0, 0)))
    grid = (n_pad // TR,)

    alpha1 = jnp.asarray(alpha, dtype=jnp.float32).reshape(1)   # SMEM scalar
    gamma2 = gamma.reshape(1, D)
    beta2 = beta.reshape(1, D)

    # Explicit VMEM budget: double-buffered in/out tiles + resident params.
    tile_bytes = TR * D * x.dtype.itemsize
    param_bytes = 2 * D * max(gamma.dtype.itemsize, 4)
    vmem_bytes = int(min(max(4 * tile_bytes + 2 * param_bytes + (2 << 20),
                             4 << 20),
                         64 << 20))

    out = pl.pallas_call(
        dyt_kernel,
        out_shape=jax.ShapeDtypeStruct((n_pad, D), x.dtype),
        grid=grid,
        in_specs=[
            pl.BlockSpec(memory_space=pltpu.MemorySpace.SMEM),      # alpha
            pl.BlockSpec((TR, D), lambda i: (i, 0)),                # x tile
            pl.BlockSpec((1, D), lambda i: (0, 0)),                 # gamma (resident)
            pl.BlockSpec((1, D), lambda i: (0, 0)),                 # beta  (resident)
        ],
        out_specs=pl.BlockSpec((TR, D), lambda i: (i, 0)),
        compiler_params=pltpu.CompilerParams(
            dimension_semantics=("parallel",),
            vmem_limit_bytes=vmem_bytes,
        ),
    )(alpha1, x2, gamma2, beta2)

    if n_pad != N:
        out = out[:N]
    return out.reshape(orig_shape)


def _reference(x, alpha, gamma, beta):
    """Pure-JAX reference matching the PyTorch module."""
    return gamma * jnp.tanh(alpha * x) + beta


if __name__ == "__main__":
    B, S, D = 2, 8, 32  # batch, seq, dim

    key = jax.random.PRNGKey(0)
    kx, kg, kb = jax.random.split(key, 3)

    x = jax.random.normal(kx, (B, S, D), dtype=jnp.float32)

    # Module init is alpha=0.5, gamma=ones, beta=zeros; perturb gamma/beta so
    # the test exercises the broadcasts non-trivially.
    alpha = jnp.full((1,), 0.5, dtype=jnp.float32)
    gamma = 1.0 + 0.1 * jax.random.normal(kg, (D,), dtype=jnp.float32)
    beta = 0.1 * jax.random.normal(kb, (D,), dtype=jnp.float32)

    out = dynamic_tanh_norm(x, alpha, gamma, beta)
    out = jax.block_until_ready(out)

    ref = _reference(x, alpha, gamma, beta)
    assert out.shape == ref.shape
    assert out.dtype == ref.dtype
    assert jnp.allclose(out, ref, atol=1e-5, rtol=1e-5)

    print("KERNEL_OK")
</pallas_src>

<mosaic_0001>
module attributes {stable_mosaic.version = 11 : i64} {
  func.func @dyt_kernel(%arg0: i32, %arg1: memref<1xf32, #tpu.memory_space<smem>>, %arg2: memref<16x32xf32, #tpu.memory_space<vmem>>, %arg3: memref<1x32xf32, #tpu.memory_space<vmem>>, %arg4: memref<1x32xf32, #tpu.memory_space<vmem>>, %arg5: memref<16x32xf32, #tpu.memory_space<vmem>>) attributes {dimension_semantics = [#tpu.dimension_semantics<parallel>], iteration_bounds = array<i64: 1>, scalar_prefetch = 0 : i64, scratch_operands = 0 : i64, tpu.core_type = #tpu.core_type<tc>, window_params = [{transform_indices = @transform_0, window_bounds = array<i64: 1>}, {transform_indices = @transform_1, window_bounds = array<i64: 16, 32>}, {pipeline_mode = #tpu.pipeline_mode<synchronous>, transform_indices = @transform_2, window_bounds = array<i64: 1, 32>}, {pipeline_mode = #tpu.pipeline_mode<synchronous>, transform_indices = @transform_3, window_bounds = array<i64: 1, 32>}, {transform_indices = @transform_4, window_bounds = array<i64: 16, 32>}]} {
    %c0 = arith.constant 0 : index
    %0 = memref.load %arg1[%c0] : memref<1xf32, #tpu.memory_space<smem>>
    %c0_0 = arith.constant 0 : index
    %c0_1 = arith.constant 0 : index
    %1 = vector.load %arg2[%c0_0, %c0_1] : memref<16x32xf32, #tpu.memory_space<vmem>>, vector<16x32xf32>
    %2 = vector.broadcast %0 : f32 to vector<16x32xf32>
    %3 = arith.mulf %1, %2 : vector<16x32xf32>
    %4 = math.tanh %3 : vector<16x32xf32>
    %c0_2 = arith.constant 0 : index
    %c0_3 = arith.constant 0 : index
    %5 = vector.load %arg3[%c0_2, %c0_3] : memref<1x32xf32, #tpu.memory_space<vmem>>, vector<1x32xf32>
    %c0_4 = arith.constant 0 : index
    %c0_5 = arith.constant 0 : index
    %6 = vector.load %arg4[%c0_4, %c0_5] : memref<1x32xf32, #tpu.memory_space<vmem>>, vector<1x32xf32>
    %7 = vector.broadcast %5 : vector<1x32xf32> to vector<16x32xf32>
    %8 = arith.mulf %4, %7 : vector<16x32xf32>
    %9 = vector.broadcast %6 : vector<1x32xf32> to vector<16x32xf32>
    %10 = arith.addf %8, %9 : vector<16x32xf32>
    %c0_6 = arith.constant 0 : index
    %c0_7 = arith.constant 0 : index
    %11 = vector.load %arg5[%c0_6, %c0_7] : memref<16x32xf32, #tpu.memory_space<vmem>>, vector<16x32xf32>
    tpu.vector_store %arg5[%c0_6, %c0_7], %10 {strides = array<i32>} : memref<16x32xf32, #tpu.memory_space<vmem>>, vector<16x32xf32>,
    return
  }
  func.func @transform_0(%arg0: i32) -> i32 {
    %c0_i32 = arith.constant 0 : i32
    %c0_i32_0 = arith.constant 0 : i32
    return %c0_i32 : i32
  }
  func.func @transform_1(%arg0: i32) -> (i32, i32) {
    %c0_i32 = arith.constant 0 : i32
    %c0_i32_0 = arith.constant 0 : i32
    return %arg0, %c0_i32 : i32, i32
  }
  func.func @transform_2(%arg0: i32) -> (i32, i32) {
    %c0_i32 = arith.constant 0 : i32
    %c0_i32_0 = arith.constant 0 : i32
    %c0_i32_1 = arith.constant 0 : i32
    return %c0_i32, %c0_i32_0 : i32, i32
  }
  func.func @transform_3(%arg0: i32) -> (i32, i32) {
    %c0_i32 = arith.constant 0 : i32
    %c0_i32_0 = arith.constant 0 : i32
    %c0_i32_1 = arith.constant 0 : i32
    return %c0_i32, %c0_i32_0 : i32, i32
  }
  func.func @transform_4(%arg0: i32) -> (i32, i32) {
    %c0_i32 = arith.constant 0 : i32
    %c0_i32_0 = arith.constant 0 : i32
    return %arg0, %c0_i32 : i32, i32
  }
}

</mosaic_0001>

<bundles_post_ra>
// kernel: tpu_custom_call.1
= control target key start
LH: loop header
LB: loop body
LE: loop exit
PB: predicated region body
PF: predicated region fallthrough
CT: control target
= control target key end

     0   :  { %10 = vsyncpa [#allocation4], 0  ;;  %s205_s0 = inlined_call_operand.<no memory space> [shape: f32[1], index: 0, kind: input, shape index: {}]   ;;  %s206_s1 = inlined_call_operand.hbm [shape: f32[16,32], index: 1, kind: input, shape index: {}]   ;;  %s207_s2 = inlined_call_operand.vmem [shape: f32[1,32], index: 2, kind: input, shape index: {}]   ;;  %s208_s3 = inlined_call_operand.vmem [shape: f32[1,32], index: 3, kind: input, shape index: {}]   ;;  %s209_s4 = inlined_call_operand.hbm [shape: f32[16,32], index: 4, kind: output, shape index: {}]  }
   0x1   :  { %11 = vsyncpa [#allocation5], 0  ;;  %s137_s15 = smov [#allocation3]   ;;  %s89_s19 = scalar_lea.hbm %s206_s1, 256 }
   0x2   :  { %s19_s16 = sshll.u32 %s137_s15, 4  ;;  %p90_p0 = scmp.ne.s32.totalorder %s206_s1, %s89_s19  ;;  %s20_s16 = int_to_ptr.vmem [resolvable:$true] %s19_s16 }
   0x3   :  { %p93_p1 = scmp.lt.u32.totalorder %s89_s19, %s206_s1 }
   0x5   :  { %p95_p2 = pnand %p93_p1, %p90_p0 }
   0x7   :  { %98 = shalt.err (!%p95_p2)
}
   0x8   :  { %s99_s24 = scalar_lea.vmem %s20_s16, 256  ;;  %p104_p4 = scmp.lt.s32.totalorder %s20_s16, %s20_s16 }
   0x9   :  { %p100_p3 = scmp.ne.s32.totalorder %s20_s16, %s99_s24  ;;  %p105_p5 = scmp.lt.s32.totalorder %s99_s24, %s99_s24 }
   0xb   :  { %p106_p6 = por %p105_p5, %p104_p4 }
   0xd   :  { %p107_p7 = pnand %p106_p6, %p100_p3 }
   0xf   :  { %110 = shalt.err (!%p107_p7)
}
  0x10   :  { %s138_s25 = smov 128   ;;  %s139_s26 = smov 8  }
  0x11   :  { %25 = dma.hbm_to_vmem [thread:$0]  %s206_s1, 256, %s20_s16, [#allocation4], %s138_s25, %s138_s25, %s139_s26  }
  0x12   :  { %133 = dma.done.wait [#allocation4], 256  }
  0x13   :  { %134 = vsyncadd [#allocation4], 4294967040  ;;  %v36_v0 = vstv %s205_s0  ;;  %v34_v1 = vld [vmem:[#allocation3] sm:$0xff]  ;;  %v35_v3 = vld [vmem:[#allocation3 + $0x8] sm:$0xff]  ;;  %s140_s1 = smov [#allocation6]   ;;  %vm59_vm0 = vcmask 261120  }
  0x14   :  { %v37_v2 = vmul.f32 %v36_v0, %v34_v1  ;;  %v38_v4 = vmul.f32 %v36_v0, %v35_v3  ;;  %v79_v5 = vld [vmem:[%s207_s2] ss:$0 sm:$0xff]  ;;  %s67_s9 = sshll.u32 %s140_s1, 4  ;;  %s68_s9 = int_to_ptr.vmem [resolvable:$true] %s67_s9 }
  0x15   :  { %v80_v7 = vld [vmem:[%s208_s3] ss:$0 sm:$0xff]  ;;  %s111_s0 = scalar_lea.vmem %s68_s9, 256  ;;  %p116_p9 = scmp.lt.s32.totalorder %s68_s9, %s68_s9 }
  0x16   :  { %85 = vtanh.f32 %v37_v2  ;;  %p112_p8 = scmp.ne.s32.totalorder %s68_s9, %s111_s0  ;;  %p117_p10 = scmp.lt.s32.totalorder %s111_s0, %s111_s0 }
  0x17   :  { %87 = vtanh.f32 %v38_v4 }
  0x18   :  { %p118_p11 = por %p117_p10, %p116_p9 }
  0x1a   :  { %p119_p12 = pnand %p118_p11, %p112_p8 }
  0x20   :  { %v86_v6 = vpop.eup %85 }
  0x21   :  { %v88_v8 = vpop.eup %87  ;;  %v49_v9 = vmul.f32 %v86_v6, %v79_v5 }
  0x22   :  { %v50_v10 = vmul.f32 %v88_v8, %v79_v5 }
  0x23   :  { %v57_v11 = vadd.f32 %v80_v7, %v49_v9 }
  0x24   :  { %v58_v12 = vadd.f32 %v80_v7, %v50_v10 }
  0x25   :  { %60 = vst.msk [vmem:[#allocation6] sm:$0xff] %vm59_vm0, %v57_v11 }
  0x26   :  { %61 = vst.msk [vmem:[#allocation6 + $0x8] sm:$0xff] %vm59_vm0, %v58_v12 }
  0x27   :  { %122 = shalt.err (!%p119_p12)
}
  0x28   :  { %s123_s10 = scalar_lea.hbm %s209_s4, 256 }
  0x29   :  { %p124_p13 = scmp.ne.s32.totalorder %s209_s4, %s123_s10  ;;  %p127_p0 = scmp.lt.u32.totalorder %s123_s10, %s209_s4 }
  0x2b   :  { %p129_p1 = pnand %p127_p0, %p124_p13 }
  0x2d   :  { %132 = shalt.err (!%p129_p1)
}
  0x2e   :  { %73 = dma.vmem_to_hbm [thread:$0]  %s68_s9, 256, %s209_s4, [#allocation5], %s138_s25, %s138_s25, %s139_s26  }
  0x2f   :  { %135 = dma.done.wait [#allocation5], 256  }
  0x30   :  { %136 = vsyncadd [#allocation5], 4294967040 }
  0x31   :  { %77 = vsyncpa [#allocation4], 1 }
  0x32   :  { %78 = vsyncpa [#allocation5], 1 }

</bundles_post_ra>
